<compile_context>
chip_gen: v6e
topology: v6e:2x2x1
jax: 0.10.0
libtpu: 0.0.40
codegen_flags: <defaults>
</compile_context>

<pallas_src>
import math
from functools import partial

import jax
import jax.numpy as jnp
from jax.experimental import pallas as pl
from jax.experimental.pallas import tpu as pltpu


def _round_up(x: int, m: int) -> int:
    return ((x + m - 1) // m) * m


def _gelu_proj_kernel(x_ref, w_ref, b_ref, o_ref, acc_ref, *, approximate: str):
    # x_ref: (tm, tk)   w_ref: (tn, tk)  [PyTorch layout]   b_ref: (1, tn)
    @pl.when(pl.program_id(2) == 0)
    def _():
        # Fold the bias add into the accumulator init (saves an epilogue VADD).
        acc_ref[...] = jnp.broadcast_to(
            b_ref[...].astype(jnp.float32), acc_ref.shape
        )

    # Contract the K axis of both operands: (tm, tk) x (tn, tk) -> (tm, tn).
    acc_ref[...] += jax.lax.dot_general(
        x_ref[...], w_ref[...],
        dimension_numbers=(((1,), (1,)), ((), ())),
        preferred_element_type=jnp.float32,
    )

    # Epilogue: GELU only once, after the last K step.
    @pl.when(pl.program_id(2) == pl.num_programs(2) - 1)
    def _():
        y = acc_ref[...]
        if approximate == "tanh":
            # torch.nn.functional.gelu(..., approximate="tanh"); tanh rides the EUP slot.
            c = math.sqrt(2.0 / math.pi)
            g = 0.5 * y * (1.0 + jnp.tanh(c * (y + 0.044715 * y * y * y)))
        else:
            # exact GELU: 0.5 * y * (1 + erf(y / sqrt(2)))
            g = 0.5 * y * (1.0 + jax.lax.erf(y * (1.0 / math.sqrt(2.0))))
        o_ref[...] = g.astype(o_ref.dtype)


def gelu_proj(x, weight, bias=None, *, approximate: str = "none",
              tm: int = 256, tn: int = 256, tk: int = 512):
    """Pallas equivalent of GELU.forward (Linear projection + GELU).

    x:      (..., dim_in)
    weight: (dim_out, dim_in)  -- PyTorch nn.Linear layout (no transpose needed)
    bias:   (dim_out,) or None
    """
    dim_in = x.shape[-1]
    dim_out = weight.shape[0]
    lead = x.shape[:-1]
    m = math.prod(lead) if lead else 1

    x2d = x.reshape(m, dim_in)
    if bias is None:
        bias = jnp.zeros((dim_out,), dtype=x.dtype)
    b2d = bias.reshape(1, dim_out)

    # Clamp tiles to (padded) problem size; respect (8, 128) layout minimums.
    tm = min(tm, _round_up(m, 8))
    tn = min(tn, _round_up(dim_out, 128))
    tk = min(tk, _round_up(dim_in, 128))

    mp = _round_up(m, tm)
    np_ = _round_up(dim_out, tn)
    kp = _round_up(dim_in, tk)

    # Zero-pad to tile multiples (zeros are exact no-ops for the matmul; padded
    # output rows/cols are sliced off below).
    if (mp, kp) != (m, dim_in):
        x2d = jnp.pad(x2d, ((0, mp - m), (0, kp - dim_in)))
    w = weight
    if (np_, kp) != (dim_out, dim_in):
        w = jnp.pad(w, ((0, np_ - dim_out), (0, kp - dim_in)))
    if np_ != dim_out:
        b2d = jnp.pad(b2d, ((0, 0), (0, np_ - dim_out)))

    grid = (mp // tm, np_ // tn, kp // tk)
    kernel = partial(_gelu_proj_kernel, approximate=approximate)

    bytes_per = jnp.dtype(x.dtype).itemsize
    cost = pl.CostEstimate(
        flops=2 * mp * np_ * kp,
        transcendentals=mp * np_,
        bytes_accessed=(mp * kp + np_ * kp + np_ + mp * np_) * bytes_per,
    )

    out2d = pl.pallas_call(
        kernel,
        out_shape=jax.ShapeDtypeStruct((mp, np_), x.dtype),
        grid_spec=pltpu.PrefetchScalarGridSpec(
            num_scalar_prefetch=0,
            grid=grid,
            in_specs=[
                pl.BlockSpec((tm, tk), lambda i, j, k: (i, k)),   # x tile
                pl.BlockSpec((tn, tk), lambda i, j, k: (j, k)),   # W tile (PyTorch layout)
                pl.BlockSpec((1, tn), lambda i, j, k: (0, j)),    # bias tile (N only)
            ],
            out_specs=pl.BlockSpec((tm, tn), lambda i, j, k: (i, j)),
            scratch_shapes=[pltpu.VMEM((tm, tn), jnp.float32)],
        ),
        compiler_params=pltpu.CompilerParams(
            dimension_semantics=("parallel", "parallel", "arbitrary"),
        ),
        cost_estimate=cost,
    )(x2d, w, b2d)

    out2d = out2d[:m, :dim_out]
    return out2d.reshape(*lead, dim_out)


if __name__ == "__main__":
    # Small shapes consistent with the module: tokens of width dim_in -> dim_out.
    batch, seq, dim_in, dim_out = 2, 8, 32, 128

    key = jax.random.PRNGKey(0)
    kx, kw, kb = jax.random.split(key, 3)

    x = jax.random.normal(kx, (batch, seq, dim_in), dtype=jnp.float32)
    # Deterministic "Linear" params (synthetic init, not a checkpoint).
    bound = 1.0 / math.sqrt(dim_in)
    weight = jax.random.uniform(kw, (dim_out, dim_in), minval=-bound, maxval=bound,
                                dtype=jnp.float32)
    bias = jax.random.uniform(kb, (dim_out,), minval=-bound, maxval=bound,
                              dtype=jnp.float32)

    # Exact GELU (module default approximate="none").
    out = gelu_proj(x, weight, bias, approximate="none")
    out = jax.block_until_ready(out)
    ref = jax.nn.gelu(x @ weight.T + bias, approximate=False)
    assert out.shape == (batch, seq, dim_out)
    assert jnp.allclose(out, ref, atol=2e-5, rtol=2e-5)

    # Tanh-approximate GELU path (approximate="tanh").
    out_t = gelu_proj(x, weight, bias, approximate="tanh")
    out_t = jax.block_until_ready(out_t)
    ref_t = jax.nn.gelu(x @ weight.T + bias, approximate=True)
    assert jnp.allclose(out_t, ref_t, atol=2e-5, rtol=2e-5)

    # No-bias configuration (bias=False in the module).
    out_nb = gelu_proj(x, weight, None, approximate="none")
    out_nb = jax.block_until_ready(out_nb)
    ref_nb = jax.nn.gelu(x @ weight.T, approximate=False)
    assert jnp.allclose(out_nb, ref_nb, atol=2e-5, rtol=2e-5)

    print("KERNEL_OK")
</pallas_src>

<mosaic_0001>
module attributes {stable_mosaic.version = 11 : i64} {
  func.func @_gelu_proj_kernel(%arg0: i32, %arg1: i32, %arg2: i32, %arg3: memref<16x128xf32, #tpu.memory_space<vmem>>, %arg4: memref<128x128xf32, #tpu.memory_space<vmem>>, %arg5: memref<1x128xf32, #tpu.memory_space<vmem>>, %arg6: memref<16x128xf32, #tpu.memory_space<vmem>>, %arg7: memref<16x128xf32, #tpu.memory_space<vmem>>) attributes {dimension_semantics = [#tpu.dimension_semantics<parallel>, #tpu.dimension_semantics<parallel>, #tpu.dimension_semantics<arbitrary>], iteration_bounds = array<i64: 1, 1, 1>, scalar_prefetch = 0 : i64, scratch_operands = 1 : i64, tpu.core_type = #tpu.core_type<tc>, window_params = [{transform_indices = @transform_0, window_bounds = array<i64: 16, 128>}, {transform_indices = @transform_1, window_bounds = array<i64: 128, 128>}, {transform_indices = @transform_2, window_bounds = array<i64: 1, 128>}, {transform_indices = @transform_3, window_bounds = array<i64: 16, 128>}]} {
    %c0_i32 = arith.constant 0 : i32
    %0 = arith.cmpi eq, %arg2, %c0_i32 : i32
    %1 = arith.extui %0 : i1 to i32
    %c0_i32_0 = arith.constant 0 : i32
    %2 = arith.cmpi ne, %1, %c0_i32_0 : i32
    scf.if %2 {
      %c0_10 = arith.constant 0 : index
      %c0_11 = arith.constant 0 : index
      %12 = vector.load %arg5[%c0_10, %c0_11] : memref<1x128xf32, #tpu.memory_space<vmem>>, vector<1x128xf32>
      %13 = vector.shape_cast %12 : vector<1x128xf32> to vector<1x128xf32>
      %14 = vector.broadcast %13 : vector<1x128xf32> to vector<16x128xf32>
      %c0_12 = arith.constant 0 : index
      %c0_13 = arith.constant 0 : index
      %15 = vector.load %arg7[%c0_12, %c0_13] : memref<16x128xf32, #tpu.memory_space<vmem>>, vector<16x128xf32>
      tpu.vector_store %arg7[%c0_12, %c0_13], %14 {strides = array<i32>} : memref<16x128xf32, #tpu.memory_space<vmem>>, vector<16x128xf32>,
    } else {
    }
    %c0 = arith.constant 0 : index
    %c0_1 = arith.constant 0 : index
    %3 = vector.load %arg7[%c0, %c0_1] : memref<16x128xf32, #tpu.memory_space<vmem>>, vector<16x128xf32>
    %c0_2 = arith.constant 0 : index
    %c0_3 = arith.constant 0 : index
    %4 = vector.load %arg3[%c0_2, %c0_3] : memref<16x128xf32, #tpu.memory_space<vmem>>, vector<16x128xf32>
    %c0_4 = arith.constant 0 : index
    %c0_5 = arith.constant 0 : index
    %5 = vector.load %arg4[%c0_4, %c0_5] : memref<128x128xf32, #tpu.memory_space<vmem>>, vector<128x128xf32>
    %cst = arith.constant dense<0.000000e+00> : vector<16x128xf32>
    %6 = tpu.matmul %4, %5, %cst {dimension_numbers = #tpu.dot_dimension_numbers<[1], [1], [0], [0], [0, 0, 1, 0], [], []>} : vector<16x128xf32>, vector<128x128xf32>, vector<16x128xf32> -> vector<16x128xf32>
    %7 = arith.addf %3, %6 : vector<16x128xf32>
    %c0_6 = arith.constant 0 : index
    %c0_7 = arith.constant 0 : index
    %8 = vector.load %arg7[%c0_6, %c0_7] : memref<16x128xf32, #tpu.memory_space<vmem>>, vector<16x128xf32>
    tpu.vector_store %arg7[%c0_6, %c0_7], %7 {strides = array<i32>} : memref<16x128xf32, #tpu.memory_space<vmem>>, vector<16x128xf32>,
    %c0_i32_8 = arith.constant 0 : i32
    %9 = arith.cmpi eq, %arg2, %c0_i32_8 : i32
    %10 = arith.extui %9 : i1 to i32
    %c0_i32_9 = arith.constant 0 : i32
    %11 = arith.cmpi ne, %10, %c0_i32_9 : i32
    scf.if %11 {
      %c0_10 = arith.constant 0 : index
      %c0_11 = arith.constant 0 : index
      %12 = vector.load %arg7[%c0_10, %c0_11] : memref<16x128xf32, #tpu.memory_space<vmem>>, vector<16x128xf32>
      %cst_12 = arith.constant 5.000000e-01 : f32
      %13 = vector.broadcast %cst_12 : f32 to vector<16x128xf32>
      %14 = arith.mulf %13, %12 : vector<16x128xf32>
      %cst_13 = arith.constant 0.707106769 : f32
      %15 = vector.broadcast %cst_13 : f32 to vector<16x128xf32>
      %16 = arith.mulf %12, %15 : vector<16x128xf32>
      %17 = math.erf %16 : vector<16x128xf32>
      %cst_14 = arith.constant 1.000000e+00 : f32
      %18 = vector.broadcast %cst_14 : f32 to vector<16x128xf32>
      %19 = arith.addf %18, %17 : vector<16x128xf32>
      %20 = arith.mulf %14, %19 : vector<16x128xf32>
      %c0_15 = arith.constant 0 : index
      %c0_16 = arith.constant 0 : index
      %21 = vector.load %arg6[%c0_15, %c0_16] : memref<16x128xf32, #tpu.memory_space<vmem>>, vector<16x128xf32>
      tpu.vector_store %arg6[%c0_15, %c0_16], %20 {strides = array<i32>} : memref<16x128xf32, #tpu.memory_space<vmem>>, vector<16x128xf32>,
    } else {
    }
    return
  }
  func.func @transform_0(%arg0: i32, %arg1: i32, %arg2: i32) -> (i32, i32) {
    %c0_i32 = arith.constant 0 : i32
    return %arg0, %arg2 : i32, i32
  }
  func.func @transform_1(%arg0: i32, %arg1: i32, %arg2: i32) -> (i32, i32) {
    %c0_i32 = arith.constant 0 : i32
    return %arg1, %arg2 : i32, i32
  }
  func.func @transform_2(%arg0: i32, %arg1: i32, %arg2: i32) -> (i32, i32) {
    %c0_i32 = arith.constant 0 : i32
    %c0_i32_0 = arith.constant 0 : i32
    return %c0_i32, %arg1 : i32, i32
  }
  func.func @transform_3(%arg0: i32, %arg1: i32, %arg2: i32) -> (i32, i32) {
    %c0_i32 = arith.constant 0 : i32
    return %arg0, %arg1 : i32, i32
  }
}

</mosaic_0001>

<bundles_post_ra>
// kernel: tpu_custom_call.1
= control target key start
LH: loop header
LB: loop body
LE: loop exit
PB: predicated region body
PF: predicated region fallthrough
CT: control target
= control target key end

     0   :  { %8 = vsyncpa [#allocation4], 0  ;;  %s365_s0 = inlined_call_operand.hbm [shape: f32[16,128], index: 0, kind: input, shape index: {}]   ;;  %s366_s1 = inlined_call_operand.hbm [shape: f32[128,128], index: 1, kind: input, shape index: {}]   ;;  %s367_s2 = inlined_call_operand.vmem [shape: f32[1,128], index: 2, kind: input, shape index: {}]   ;;  %s368_s3 = inlined_call_operand.hbm [shape: f32[16,128], index: 3, kind: output, shape index: {}]  }
   0x1   :  { %9 = vsyncpa [#allocation7], 0 }
   0x2   :  { %10 = vsyncpa [#allocation5], 0  ;;  %s319_s12 = smov [#allocation3]  }
   0x3   :  { %s16_s13 = sshll.u32 %s319_s12, 4  ;;  %s17_s13 = int_to_ptr.vmem [resolvable:$true] %s16_s13 }
   0x4   :  { %s261_s14 = scalar_lea.vmem %s17_s13, 256  ;;  %p266_p1 = scmp.lt.s32.totalorder %s17_s13, %s17_s13 }
   0x5   :  { %p262_p0 = scmp.ne.s32.totalorder %s17_s13, %s261_s14  ;;  %p267_p2 = scmp.lt.s32.totalorder %s261_s14, %s261_s14 }
   0x7   :  { %p268_p3 = por %p267_p2, %p266_p1 }
   0x9   :  { %p269_p4 = pnand %p268_p3, %p262_p0 }
   0xb   :  { %272 = shalt.err (!%p269_p4)
}
   0xc   :  { %s320_s15 = smov 128   ;;  %s321_s16 = smov 8  }
   0xd   :  { %22 = dma.hbm_to_vmem [thread:$0]  %s365_s0, 256, %s17_s13, [#allocation4], %s320_s15, %s320_s15, %s321_s16  }
   0xe   :  { %s322_s19 = smov [#allocation6]  }
   0xf   :  { %s28_s20 = sshll.u32 %s322_s19, 4  ;;  %s29_s20 = int_to_ptr.vmem [resolvable:$true] %s28_s20 }
  0x10   :  { %s281_s21 = scalar_lea.vmem %s29_s20, 2048  ;;  %p286_p6 = scmp.lt.s32.totalorder %s29_s20, %s29_s20 }
  0x11   :  { %p282_p5 = scmp.ne.s32.totalorder %s29_s20, %s281_s21  ;;  %p287_p7 = scmp.lt.s32.totalorder %s281_s21, %s281_s21 }
  0x13   :  { %p288_p8 = por %p287_p7, %p286_p6 }
  0x15   :  { %p289_p9 = pnand %p288_p8, %p282_p5 }
  0x17   :  { %292 = shalt.err (!%p289_p9)
}
  0x18   :  { %34 = dma.hbm_to_vmem [thread:$0]  %s366_s1, 2048, %s29_s20, [#allocation7], %s320_s15, %s320_s15, %s321_s16  }
  0x19   :  { %313 = dma.done.wait [#allocation4], 256  }
  0x1a   :  { %314 = vsyncadd [#allocation4], 4294967040 }
  0x1b   :  { %315 = dma.done.wait [#allocation7], 2048  }
  0x1c   :  { %316 = vsyncadd [#allocation7], 4294965248  ;;  %v75_v0 = vld [vmem:[#allocation6 + $0x78] sm:$0xff]  ;;  %v74_v1 = vld [vmem:[#allocation6 + $0x70] sm:$0xff]  ;;  %s323_s24 = smov [#allocation8]  }
  0x1d   :  { %209 = vmatprep.subr.mxu0 %v75_v0  ;;  %v73_v2 = vld [vmem:[#allocation6 + $0x68] sm:$0xff]  ;;  %v58_v3 = vld [vmem:[#allocation3] sm:$0xff]  ;;  %v72_v4 = vld [vmem:[#allocation6 + $0x60] sm:$0xff]  ;;  %s177_s25 = sshll.u32 %s323_s24, 4  ;;  %s178_s25 = int_to_ptr.vmem [resolvable:$true] %s177_s25 }
  0x1e   :  { %210 = vmatpush3.xpose.msra.mxu0 %v75_v0  ;;  %241 = vmatprep.mubr.f32.mxu0 %v58_v3  ;;  %v71_v5 = vld [vmem:[#allocation6 + $0x58] sm:$0xff]  ;;  %v70_v6 = vld [vmem:[#allocation6 + $0x50] sm:$0xff]  ;;  %v69_v7 = vld [vmem:[#allocation6 + $0x48] sm:$0xff]  ;;  %p298_p11 = scmp.lt.s32.totalorder %s178_s25, %s178_s25 }
  0x1f   :  { %211 = vmatprep.subr.mxu0 %v74_v1  ;;  %v68_v8 = vld [vmem:[#allocation6 + $0x40] sm:$0xff]  ;;  %v67_v9 = vld [vmem:[#allocation6 + $0x38] sm:$0xff]  ;;  %v66_v10 = vld [vmem:[#allocation6 + $0x30] sm:$0xff] }
  0x20   :  { %v65_v11 = vld [vmem:[#allocation6 + $0x28] sm:$0xff]  ;;  %v64_v12 = vld [vmem:[#allocation6 + $0x20] sm:$0xff]  ;;  %v63_v13 = vld [vmem:[#allocation6 + $0x18] sm:$0xff] }
  0x21   :  { %v62_v14 = vld [vmem:[#allocation6 + $0x10] sm:$0xff]  ;;  %v61_v15 = vld [vmem:[#allocation6 + $0x8] sm:$0xff]  ;;  %v60_v16 = vld [vmem:[#allocation6] sm:$0xff] }
  0x22   :  { %212 = vmatpush3.xpose.msra.mxu0 %v74_v1  ;;  %v59_v17 = vld [vmem:[#allocation3 + $0x8] sm:$0xff]  ;;  %v190_v18 = vld [vmem:[%s367_s2] ss:$0 sm:$0xff]  ;;  %s293_s2 = scalar_lea.vmem %s178_s25, 256 }
  0x23   :  { %213 = vmatprep.subr.mxu0 %v73_v2  ;;  %p294_p10 = scmp.ne.s32.totalorder %s178_s25, %s293_s2  ;;  %p299_p12 = scmp.lt.s32.totalorder %s293_s2, %s293_s2 }
  0x25   :  { %p300_p13 = por %p299_p12, %p298_p11 }
  0x26   :  { %214 = vmatpush3.xpose.msra.mxu0 %v73_v2 }
  0x27   :  { %215 = vmatprep.subr.mxu0 %v72_v4  ;;  %p301_p0 = pnand %p300_p13, %p294_p10 }
  0x2a   :  { %216 = vmatpush3.xpose.msra.mxu0 %v72_v4 }
  0x2b   :  { %217 = vmatprep.subr.mxu0 %v71_v5 }
  0x2e   :  { %218 = vmatpush3.xpose.msra.mxu0 %v71_v5 }
  0x2f   :  { %219 = vmatprep.subr.mxu0 %v70_v6 }
  0x32   :  { %220 = vmatpush3.xpose.msra.mxu0 %v70_v6 }
  0x33   :  { %221 = vmatprep.subr.mxu0 %v69_v7 }
  0x36   :  { %222 = vmatpush3.xpose.msra.mxu0 %v69_v7 }
  0x37   :  { %223 = vmatprep.subr.mxu0 %v68_v8 }
  0x3a   :  { %224 = vmatpush3.xpose.msra.mxu0 %v68_v8 }
  0x3b   :  { %225 = vmatprep.subr.mxu0 %v67_v9 }
  0x3e   :  { %226 = vmatpush3.xpose.msra.mxu0 %v67_v9 }
  0x3f   :  { %227 = vmatprep.subr.mxu0 %v66_v10 }
  0x42   :  { %228 = vmatpush3.xpose.msra.mxu0 %v66_v10 }
  0x43   :  { %229 = vmatprep.subr.mxu0 %v65_v11 }
  0x46   :  { %230 = vmatpush3.xpose.msra.mxu0 %v65_v11 }
  0x47   :  { %231 = vmatprep.subr.mxu0 %v64_v12 }
  0x4a   :  { %232 = vmatpush3.xpose.msra.mxu0 %v64_v12 }
  0x4b   :  { %233 = vmatprep.subr.mxu0 %v63_v13 }
  0x4e   :  { %234 = vmatpush3.xpose.msra.mxu0 %v63_v13 }
  0x4f   :  { %235 = vmatprep.subr.mxu0 %v62_v14 }
  0x52   :  { %236 = vmatpush3.xpose.msra.mxu0 %v62_v14 }
  0x53   :  { %237 = vmatprep.subr.mxu0 %v61_v15 }
  0x56   :  { %238 = vmatpush3.xpose.msra.mxu0 %v61_v15 }
  0x57   :  { %239 = vmatprep.subr.mxu0 %v60_v16 }
  0x5a   :  { %240 = vmatpush3.xpose.msra.mxu0 %v60_v16 }
  0x5d   :  { %242 = vmatmul.mubr.f32.vlgmr.msra.gmra.mxu0 %v59_v17 }
 0x11d   :  { %v243_v19 = vpop.f32.mrf.mxu0 }
 0x11e   :  { %v152_v20 = vadd.f32 %v243_v19, %v190_v18 }
 0x11f   :  { %v142_v21 = vpop.f32.mrf.mxu0 }
 0x120   :  { %v163_v22 = vmul.f32 0.70710677, %v152_v20  ;;  %v151_v23 = vadd.f32 %v190_v18, %v142_v21  ;;  %v161_v26 = vmul.f32 0.5, %v152_v20 }
 0x122   :  { %249 = verf.f32 %v163_v22  ;;  %v162_v24 = vmul.f32 0.70710677, %v151_v23  ;;  %v160_v30 = vmul.f32 0.5, %v151_v23 }
 0x124   :  { %251 = verf.f32 %v162_v24 }
 0x12f   :  { %v250_v25 = vpop.eup %249 }
 0x130   :  { %v167_v27 = vadd.f32 1.0, %v250_v25 }
 0x131   :  { %v252_v28 = vpop.eup %251 }
 0x132   :  { %v169_v29 = vmul.f32 %v167_v27, %v161_v26  ;;  %v166_v31 = vadd.f32 1.0, %v252_v28 }
 0x134   :  { %171 = vst [vmem:[#allocation8 + $0x8] sm:$0xff] %v169_v29  ;;  %v168_v32 = vmul.f32 %v166_v31, %v160_v30 }
 0x136   :  { %170 = vst [vmem:[#allocation8] sm:$0xff] %v168_v32 }
 0x137   :  { %304 = shalt.err (!%p301_p0)
}
 0x138   :  { %183 = dma.vmem_to_hbm [thread:$0]  %s178_s25, 256, %s368_s3, [#allocation5], %s320_s15, %s320_s15, %s321_s16  }
 0x139   :  { %317 = dma.done.wait [#allocation5], 256  }
 0x13a   :  { %318 = vsyncadd [#allocation5], 4294967040 }
 0x13b   :  { %187 = vsyncpa [#allocation4], 1 }
 0x13c   :  { %188 = vsyncpa [#allocation7], 1 }
 0x13d   :  { %189 = vsyncpa [#allocation5], 1 }

</bundles_post_ra>
